<compile_context>
chip_gen: v7x
topology: tpu7x:2x2x1
jax: 0.10.0
libtpu: 0.0.40
codegen_flags: <defaults>
</compile_context>

<pallas_src>
import jax
import jax.numpy as jnp
from jax.experimental import pallas as pl
from jax.experimental.pallas import tpu as pltpu

TILE_B = 512  # default batch tile (sweep 512-1024; ~85% of HBM roofline at 512)


def _round_up(x, m):
    return ((x + m - 1) // m) * m


def _sultani_kernel(x_ref, w1_ref, b1_ref, w2_ref, b2_ref, w3_ref, b3_ref, o_ref):
    # fc1: x arrives in the caller's dtype; cast to bf16 only at the MXU input.
    # f32 accumulation; bias + ReLU epilogue in f32 (v5e has no bf16 VPU path).
    h1 = jnp.dot(x_ref[...].astype(jnp.bfloat16), w1_ref[...],
                 preferred_element_type=jnp.float32)
    h1 = jnp.maximum(h1 + b1_ref[...], 0.0)                       # (tile_b, 512)
    # TODO(synk): training-mode dropout (pltpu.prng_random_bits mask) not emitted;
    # eval-mode dropout is identity.

    # fc2: cast activation to bf16 only at the MXU input; epilogue stays f32.
    h2 = jnp.dot(h1.astype(jnp.bfloat16), w2_ref[...],
                 preferred_element_type=jnp.float32)               # (tile_b, 32)
    h2 = jnp.maximum(h2 + b2_ref[...], 0.0)

    # fc3 (32 -> 1), emitted lane-dense: (1, 32) @ (32, tile_b) -> (1, tile_b),
    # so the store is a contiguous lane-major row instead of tile_b one-lane
    # masked stores.  Tiny K/M so the extra MXU/XLU work is in idle slots.
    z = jnp.dot(w3_ref[...], h2.T, preferred_element_type=jnp.float32) + b3_ref[...]
    o_ref[...] = jax.nn.sigmoid(z).astype(o_ref.dtype)             # (1, tile_b)


def _chip_defaults():
    """Generation-specific grid semantics + scoped-VMEM limit."""
    kind = jax.devices()[0].device_kind.lower()
    if "v7" in kind:   # 2 TCs / 64 MiB VMEM: shard batch tiles across cores, keep headroom
        return pltpu.CORE_PARALLEL, 48 * 1024 * 1024
    if "v6" in kind:   # 128 MiB physical; open up the 32 MiB scoped default
        return pltpu.PARALLEL, 96 * 1024 * 1024
    if "v5" in kind:   # MXU-bound at these shapes; modest limit is plenty
        return pltpu.PARALLEL, 64 * 1024 * 1024
    return pltpu.PARALLEL, None


def sultani_net_forward(x, params, *, tile_b=TILE_B):
    """x: (B, D); params: (in, out)-layout weights, (1, out) biases. Returns (B, 1) f32."""
    B, D = x.shape
    # Clamp the batch tile for tiny batches; keep it a multiple of 8 sublanes.
    tile_b = max(8, min(tile_b, _round_up(B, 8)))
    n_tiles = pl.cdiv(B, tile_b)

    # Weights are small and call-invariant: bf16 for the MXU.  x is passed in its
    # native dtype (f32 here, bf16 if the caller already holds bf16) - no extra
    # HBM pass over (B, D) before the kernel.
    w1 = params["w1"].astype(jnp.bfloat16)                       # (D, 512)
    w2 = params["w2"].astype(jnp.bfloat16)                       # (512, 32)
    w3 = jnp.reshape(params["w3"], (1, 32)).astype(jnp.float32)  # lane-major row

    dim_sem, vmem_limit = _chip_defaults()

    flops = 2 * B * (D * 512 + 512 * 32 + 32)
    bytes_accessed = (
        B * D * x.dtype.itemsize          # x read once, native dtype
        + D * 512 * 2 + 512 * 32 * 2      # w1, w2 (bf16)
        + 32 * 4 + (512 + 32 + 1) * 4     # w3 + biases (f32)
        + n_tiles * tile_b * 4            # output (f32)
    )

    def resident(shape):
        # Constant block: DMA'd once, single-buffered (no 2x VMEM for weights).
        return pl.BlockSpec(shape, lambda i: (0, 0), pipeline_mode=pl.Buffered(1))

    out = pl.pallas_call(
        _sultani_kernel,
        out_shape=jax.ShapeDtypeStruct((n_tiles, tile_b), jnp.float32),
        grid=(n_tiles,),
        in_specs=[
            pl.BlockSpec((tile_b, D), lambda i: (i, 0)),   # x tile, default 2-deep pipeline
            resident((D, 512)),                            # w1
            resident((1, 512)),                            # b1
            resident((512, 32)),                           # w2
            resident((1, 32)),                             # b2
            resident((1, 32)),                             # w3 row
            resident((1, 1)),                              # b3
        ],
        out_specs=pl.BlockSpec((1, tile_b), lambda i: (i, 0)),    # lane-dense row per tile
        compiler_params=pltpu.CompilerParams(
            dimension_semantics=(dim_sem,),
            vmem_limit_bytes=vmem_limit,
        ),
        cost_estimate=pl.CostEstimate(
            flops=flops, transcendentals=2 * B, bytes_accessed=bytes_accessed),
    )(x, w1, params["b1"], w2, params["b2"], w3, params["b3"])

    # Lane-dense (n_tiles, tile_b) -> (B, 1); the slice drops ragged-tile rows.
    return out.reshape(-1, 1)[:B]


def _xavier_normal(key, fan_in, fan_out):
    # nn.init.xavier_normal_: std = sqrt(2 / (fan_in + fan_out)),
    # stored as (in, out) == transpose of PyTorch's (out, in) weight.
    std = (2.0 / (fan_in + fan_out)) ** 0.5
    return std * jax.random.normal(key, (fan_in, fan_out), dtype=jnp.float32)


def init_params(key, feature_dim):
    k1, k2, k3 = jax.random.split(key, 3)
    return {
        "w1": _xavier_normal(k1, feature_dim, 512),
        "b1": jnp.full((1, 512), 0.1, dtype=jnp.float32),
        "w2": _xavier_normal(k2, 512, 32),
        "b2": jnp.full((1, 32), 0.1, dtype=jnp.float32),
        "w3": _xavier_normal(k3, 32, 1),
        "b3": jnp.full((1, 1), 0.1, dtype=jnp.float32),
    }


def _reference_forward(x, params):
    # Pure f32 reference with exact module semantics (eval-mode dropout).
    h1 = jnp.maximum(x @ params["w1"] + params["b1"], 0.0)
    h2 = jnp.maximum(h1 @ params["w2"] + params["b2"], 0.0)
    return jax.nn.sigmoid(h2 @ params["w3"] + params["b3"])


if __name__ == "__main__":
    key = jax.random.PRNGKey(0)
    k_param, k_x1, k_x2 = jax.random.split(key, 3)

    D = 256
    params = init_params(k_param, D)

    # Small demo batch (single tile).
    x = jax.random.normal(k_x1, (8, D), dtype=jnp.float32)
    out = jax.block_until_ready(sultani_net_forward(x, params))
    ref = _reference_forward(x, params)
    assert out.shape == (8, 1)
    assert jnp.allclose(out, ref, atol=2e-2, rtol=0.0), (
        f"max abs err {jnp.max(jnp.abs(out - ref))}")

    # Multi-tile grid with a ragged last tile (B=40, tile_b=16 -> 3 tiles).
    x2 = jax.random.normal(k_x2, (40, D), dtype=jnp.float32)
    out2 = jax.block_until_ready(sultani_net_forward(x2, params, tile_b=16))
    ref2 = _reference_forward(x2, params)
    assert out2.shape == (40, 1)
    assert jnp.allclose(out2, ref2, atol=2e-2, rtol=0.0), (
        f"max abs err {jnp.max(jnp.abs(out2 - ref2))}")

    print("KERNEL_OK")
</pallas_src>

<mosaic_0001>
module attributes {stable_mosaic.version = 11 : i64} {
  func.func @_sultani_kernel(%arg0: i32, %arg1: memref<8x256xf32, #tpu.memory_space<vmem>>, %arg2: memref<256x512xbf16, #tpu.memory_space<vmem>>, %arg3: memref<1x512xf32, #tpu.memory_space<vmem>>, %arg4: memref<512x32xbf16, #tpu.memory_space<vmem>>, %arg5: memref<1x32xf32, #tpu.memory_space<vmem>>, %arg6: memref<1x32xf32, #tpu.memory_space<vmem>>, %arg7: memref<1x1xf32, #tpu.memory_space<vmem>>, %arg8: memref<1x8xf32, #tpu.memory_space<vmem>>) attributes {dimension_semantics = [#tpu.dimension_semantics<parallel>], iteration_bounds = array<i64: 1>, scalar_prefetch = 0 : i64, scratch_operands = 0 : i64, tpu.core_type = #tpu.core_type<tc>, window_params = [{transform_indices = @transform_0, window_bounds = array<i64: 8, 256>}, {pipeline_mode = #tpu.pipeline_mode<synchronous>, transform_indices = @transform_1, window_bounds = array<i64: 256, 512>}, {pipeline_mode = #tpu.pipeline_mode<synchronous>, transform_indices = @transform_2, window_bounds = array<i64: 1, 512>}, {pipeline_mode = #tpu.pipeline_mode<synchronous>, transform_indices = @transform_3, window_bounds = array<i64: 512, 32>}, {pipeline_mode = #tpu.pipeline_mode<synchronous>, transform_indices = @transform_4, window_bounds = array<i64: 1, 32>}, {pipeline_mode = #tpu.pipeline_mode<synchronous>, transform_indices = @transform_5, window_bounds = array<i64: 1, 32>}, {pipeline_mode = #tpu.pipeline_mode<synchronous>, transform_indices = @transform_6, window_bounds = array<i64: 1, 1>}, {transform_indices = @transform_7, window_bounds = array<i64: 1, 8>}]} {
    %c0 = arith.constant 0 : index
    %c0_0 = arith.constant 0 : index
    %0 = vector.load %arg1[%c0, %c0_0] : memref<8x256xf32, #tpu.memory_space<vmem>>, vector<8x256xf32>
    %1 = arith.truncf %0 : vector<8x256xf32> to vector<8x256xbf16>
    %c0_1 = arith.constant 0 : index
    %c0_2 = arith.constant 0 : index
    %2 = vector.load %arg2[%c0_1, %c0_2] : memref<256x512xbf16, #tpu.memory_space<vmem>>, vector<256x512xbf16>
    %cst = arith.constant dense<0.000000e+00> : vector<8x512xf32>
    %3 = tpu.matmul %1, %2, %cst {dimension_numbers = #tpu.dot_dimension_numbers<[1], [0], [0], [1], [0, 0, 1, 1], [], []>} : vector<8x256xbf16>, vector<256x512xbf16>, vector<8x512xf32> -> vector<8x512xf32>
    %c0_3 = arith.constant 0 : index
    %c0_4 = arith.constant 0 : index
    %4 = vector.load %arg3[%c0_3, %c0_4] : memref<1x512xf32, #tpu.memory_space<vmem>>, vector<1x512xf32>
    %5 = vector.broadcast %4 : vector<1x512xf32> to vector<8x512xf32>
    %6 = arith.addf %3, %5 : vector<8x512xf32>
    %cst_5 = arith.constant 0.000000e+00 : f32
    %7 = vector.broadcast %cst_5 : f32 to vector<8x512xf32>
    %8 = arith.maximumf %6, %7 : vector<8x512xf32>
    %9 = arith.truncf %8 : vector<8x512xf32> to vector<8x512xbf16>
    %c0_6 = arith.constant 0 : index
    %c0_7 = arith.constant 0 : index
    %10 = vector.load %arg4[%c0_6, %c0_7] : memref<512x32xbf16, #tpu.memory_space<vmem>>, vector<512x32xbf16>
    %cst_8 = arith.constant dense<0.000000e+00> : vector<8x32xf32>
    %11 = tpu.matmul %9, %10, %cst_8 {dimension_numbers = #tpu.dot_dimension_numbers<[1], [0], [0], [1], [0, 0, 1, 1], [], []>} : vector<8x512xbf16>, vector<512x32xbf16>, vector<8x32xf32> -> vector<8x32xf32>
    %c0_9 = arith.constant 0 : index
    %c0_10 = arith.constant 0 : index
    %12 = vector.load %arg5[%c0_9, %c0_10] : memref<1x32xf32, #tpu.memory_space<vmem>>, vector<1x32xf32>
    %13 = vector.broadcast %12 : vector<1x32xf32> to vector<8x32xf32>
    %14 = arith.addf %11, %13 : vector<8x32xf32>
    %cst_11 = arith.constant 0.000000e+00 : f32
    %15 = vector.broadcast %cst_11 : f32 to vector<8x32xf32>
    %16 = arith.maximumf %14, %15 : vector<8x32xf32>
    %c0_12 = arith.constant 0 : index
    %c0_13 = arith.constant 0 : index
    %17 = vector.load %arg6[%c0_12, %c0_13] : memref<1x32xf32, #tpu.memory_space<vmem>>, vector<1x32xf32>
    %18 = tpu.transpose %16, [1, 0] : vector<8x32xf32> -> vector<32x8xf32>
    %cst_14 = arith.constant dense<0.000000e+00> : vector<1x8xf32>
    %19 = tpu.matmul %17, %18, %cst_14 {dimension_numbers = #tpu.dot_dimension_numbers<[1], [0], [0], [1], [0, 0, 1, 1], [], []>} : vector<1x32xf32>, vector<32x8xf32>, vector<1x8xf32> -> vector<1x8xf32>
    %c0_15 = arith.constant 0 : index
    %c0_16 = arith.constant 0 : index
    %20 = vector.load %arg7[%c0_15, %c0_16] : memref<1x1xf32, #tpu.memory_space<vmem>>, vector<1x1xf32>
    %21 = vector.broadcast %20 : vector<1x1xf32> to vector<1x8xf32>
    %22 = arith.addf %19, %21 : vector<1x8xf32>
    %23 = arith.negf %22 : vector<1x8xf32>
    %24 = math.exp %23 : vector<1x8xf32>
    %cst_17 = arith.constant 1.000000e+00 : f32
    %25 = vector.broadcast %cst_17 : f32 to vector<1x8xf32>
    %26 = arith.addf %25, %24 : vector<1x8xf32>
    %27 = arith.divf %25, %26 : vector<1x8xf32>
    %c0_18 = arith.constant 0 : index
    %c0_19 = arith.constant 0 : index
    %28 = vector.load %arg8[%c0_18, %c0_19] : memref<1x8xf32, #tpu.memory_space<vmem>>, vector<1x8xf32>
    tpu.vector_store %arg8[%c0_18, %c0_19], %27 {strides = array<i32>} : memref<1x8xf32, #tpu.memory_space<vmem>>, vector<1x8xf32>,
    return
  }
  func.func @transform_0(%arg0: i32) -> (i32, i32) {
    %c0_i32 = arith.constant 0 : i32
    %c0_i32_0 = arith.constant 0 : i32
    return %arg0, %c0_i32 : i32, i32
  }
  func.func @transform_1(%arg0: i32) -> (i32, i32) {
    %c0_i32 = arith.constant 0 : i32
    %c0_i32_0 = arith.constant 0 : i32
    %c0_i32_1 = arith.constant 0 : i32
    return %c0_i32, %c0_i32_0 : i32, i32
  }
  func.func @transform_2(%arg0: i32) -> (i32, i32) {
    %c0_i32 = arith.constant 0 : i32
    %c0_i32_0 = arith.constant 0 : i32
    %c0_i32_1 = arith.constant 0 : i32
    return %c0_i32, %c0_i32_0 : i32, i32
  }
  func.func @transform_3(%arg0: i32) -> (i32, i32) {
    %c0_i32 = arith.constant 0 : i32
    %c0_i32_0 = arith.constant 0 : i32
    %c0_i32_1 = arith.constant 0 : i32
    return %c0_i32, %c0_i32_0 : i32, i32
  }
  func.func @transform_4(%arg0: i32) -> (i32, i32) {
    %c0_i32 = arith.constant 0 : i32
    %c0_i32_0 = arith.constant 0 : i32
    %c0_i32_1 = arith.constant 0 : i32
    return %c0_i32, %c0_i32_0 : i32, i32
  }
  func.func @transform_5(%arg0: i32) -> (i32, i32) {
    %c0_i32 = arith.constant 0 : i32
    %c0_i32_0 = arith.constant 0 : i32
    %c0_i32_1 = arith.constant 0 : i32
    return %c0_i32, %c0_i32_0 : i32, i32
  }
  func.func @transform_6(%arg0: i32) -> (i32, i32) {
    %c0_i32 = arith.constant 0 : i32
    %c0_i32_0 = arith.constant 0 : i32
    %c0_i32_1 = arith.constant 0 : i32
    return %c0_i32, %c0_i32_0 : i32, i32
  }
  func.func @transform_7(%arg0: i32) -> (i32, i32) {
    %c0_i32 = arith.constant 0 : i32
    %c0_i32_0 = arith.constant 0 : i32
    return %arg0, %c0_i32 : i32, i32
  }
}

</mosaic_0001>

<bundles_post_ra>
// kernel: tpu_custom_call.1
= control target key start
LH: loop header
LB: loop body
LE: loop exit
PB: predicated region body
PF: predicated region fallthrough
CT: control target
= control target key end

     0   :  { %s1523_s0 = inlined_call_operand.vmem [shape: f32[8,256], index: 0, kind: input, shape index: {}]   ;;  %s1524_s1 = inlined_call_operand.hbm [shape: bf16[256,512], index: 1, kind: input, shape index: {}]   ;;  %s1525_s2 = inlined_call_operand.vmem [shape: f32[1,512], index: 2, kind: input, shape index: {}]   ;;  %s1526_s3 = inlined_call_operand.vmem [shape: bf16[512,32], index: 3, kind: input, shape index: {}]   ;;  %s1527_s4 = inlined_call_operand.vmem [shape: f32[1,32], index: 4, kind: input, shape index: {}]   ;;  %s1528_s5 = inlined_call_operand.vmem [shape: f32[1,32], index: 5, kind: input, shape index: {}]   ;;  %s1529_s6 = inlined_call_operand.<no memory space> [shape: f32[1,1], index: 6, kind: input, shape index: {}]   ;;  %s1530_s7 = inlined_call_operand.hbm [shape: f32[1,8], index: 7, kind: output, shape index: {}]  }
   0x1   :  { %v12_v0 = vstv %s1529_s6 }
   0x2   :  { %13 = vst [vmem:[#allocation2] sm:$0x1] %v12_v0 }
   0x3   :  { %14 = vsyncpa [#allocation4], 0 }
   0x4   :  { %15 = vsyncpa [#allocation5], 0  ;;  %s1338_s26 = smov [#allocation3]   ;;  %s1290_s30 = scalar_lea.hbm %s1524_s1, 8192 }
   0x5   :  { %s23_s27 = sshll.u32 %s1338_s26, 4  ;;  %p1291_p0 = scmp.ne.s32.totalorder %s1524_s1, %s1290_s30  ;;  %s24_s27 = int_to_ptr.vmem [resolvable:$true] %s23_s27 }
   0x6   :  { %p1294_p1 = scmp.lt.u32.totalorder %s1290_s30, %s1524_s1 }
   0x8   :  { %p1296_p2 = pnand %p1294_p1, %p1291_p0 }
   0xa   :  { %1299 = shalt.err (!%p1296_p2)
}
   0xb   :  { %s1300_s6 = scalar_lea.vmem %s24_s27, 8192  ;;  %p1305_p4 = scmp.lt.s32.totalorder %s24_s27, %s24_s27 }
   0xc   :  { %p1301_p3 = scmp.ne.s32.totalorder %s24_s27, %s1300_s6  ;;  %p1306_p5 = scmp.lt.s32.totalorder %s1300_s6, %s1300_s6 }
   0xe   :  { %p1307_p6 = por %p1306_p5, %p1305_p4 }
  0x10   :  { %p1308_p7 = pnand %p1307_p6, %p1301_p3 }
  0x12   :  { %1311 = shalt.err (!%p1308_p7)
}
  0x13   :  { %s1339_s12 = smov 256   ;;  %s1340_s13 = smov 16  }
  0x14   :  { %29 = dma.hbm_to_vmem [thread:$0]  %s1524_s1, 8192, %s24_s27, [#allocation4], %s1339_s12, %s1339_s12, %s1340_s13  }
  0x15   :  { %1334 = dma.done.wait [#allocation4], 8192  }
  0x16   :  { %1335 = vsyncadd [#allocation4], 4294959104  ;;  %v1158_v1 = vld [vmem:[#allocation3 + $0x4] ss:$16 sps:$4 sm:$0xff]   ;;  %v1160_v2 = vld [vmem:[#allocation3 + $0xc] ss:$16 sps:$4 sm:$0xff]  }
  0x17   :  { %454 = vmatprep.subr.bf16.mxu0 %v1158_v1  ;;  %v1162_v3 = vld [vmem:[#allocation3] ss:$16 sps:$4 sm:$0xff]   ;;  %v1163_v4 = vld [vmem:[#allocation3 + $0x8] ss:$16 sps:$4 sm:$0xff]   ;;  %495 = vmatprep.subr.bf16.mxu1 %v1160_v2  ;;  %v1164_v5 = vld [vmem:[#allocation3 + $0x24] ss:$16 sps:$4 sm:$0xff]  }
  0x18   :  { %455 = vmatpush1.bf16.msra.mxu0 %v1162_v3  ;;  %496 = vmatpush1.bf16.msra.mxu1 %v1163_v4  ;;  %v1166_v6 = vld [vmem:[#allocation3 + $0x2c] ss:$16 sps:$4 sm:$0xff]   ;;  %v1168_v7 = vld [vmem:[#allocation3 + $0x20] ss:$16 sps:$4 sm:$0xff]   ;;  %v1169_v8 = vld [vmem:[#allocation3 + $0x28] ss:$16 sps:$4 sm:$0xff]  }
  0x19   :  { %456 = vmatprep.subr.bf16.mxu0 %v1164_v5  ;;  %497 = vmatprep.subr.bf16.mxu1 %v1166_v6  ;;  %v1170_v9 = vld [vmem:[#allocation3 + $0x44] ss:$16 sps:$4 sm:$0xff]   ;;  %v1172_v10 = vld [vmem:[#allocation3 + $0x4c] ss:$16 sps:$4 sm:$0xff]   ;;  %v1174_v11 = vld [vmem:[#allocation3 + $0x40] ss:$16 sps:$4 sm:$0xff]  }
  0x1a   :  { %v1175_v12 = vld [vmem:[#allocation3 + $0x48] ss:$16 sps:$4 sm:$0xff]   ;;  %v1176_v13 = vld [vmem:[#allocation3 + $0x64] ss:$16 sps:$4 sm:$0xff]   ;;  %v1178_v14 = vld [vmem:[#allocation3 + $0x6c] ss:$16 sps:$4 sm:$0xff]  }
  0x1b   :  { %v1180_v15 = vld [vmem:[#allocation3 + $0x60] ss:$16 sps:$4 sm:$0xff]   ;;  %v1181_v16 = vld [vmem:[#allocation3 + $0x68] ss:$16 sps:$4 sm:$0xff]   ;;  %v1182_v17 = vld [vmem:[#allocation3 + $0x84] ss:$16 sps:$4 sm:$0xff]  }
  0x1c   :  { %457 = vmatpush1.bf16.msra.mxu0 %v1168_v7  ;;  %498 = vmatpush1.bf16.msra.mxu1 %v1169_v8  ;;  %v1184_v18 = vld [vmem:[#allocation3 + $0x8c] ss:$16 sps:$4 sm:$0xff]   ;;  %v1186_v19 = vld [vmem:[#allocation3 + $0x80] ss:$16 sps:$4 sm:$0xff]   ;;  %v1187_v20 = vld [vmem:[#allocation3 + $0x88] ss:$16 sps:$4 sm:$0xff]  }
  0x1d   :  { %458 = vmatprep.subr.bf16.mxu0 %v1170_v9  ;;  %499 = vmatprep.subr.bf16.mxu1 %v1172_v10  ;;  %v1188_v21 = vld [vmem:[#allocation3 + $0xa4] ss:$16 sps:$4 sm:$0xff]   ;;  %v1190_v22 = vld [vmem:[#allocation3 + $0xac] ss:$16 sps:$4 sm:$0xff]   ;;  %v1192_v23 = vld [vmem:[#allocation3 + $0xa0] ss:$16 sps:$4 sm:$0xff]  }
  0x1e   :  { %v1193_v24 = vld [vmem:[#allocation3 + $0xa8] ss:$16 sps:$4 sm:$0xff]   ;;  %v1194_v25 = vld [vmem:[#allocation3 + $0xc4] ss:$16 sps:$4 sm:$0xff]   ;;  %v1196_v26 = vld [vmem:[#allocation3 + $0xcc] ss:$16 sps:$4 sm:$0xff]  }
  0x1f   :  { %v1198_v27 = vld [vmem:[#allocation3 + $0xc0] ss:$16 sps:$4 sm:$0xff]   ;;  %v1199_v28 = vld [vmem:[#allocation3 + $0xc8] ss:$16 sps:$4 sm:$0xff]   ;;  %v1200_v29 = vld [vmem:[#allocation3 + $0xe4] ss:$16 sps:$4 sm:$0xff]  }
  0x20   :  { %459 = vmatpush1.bf16.msra.mxu0 %v1174_v11  ;;  %500 = vmatpush1.bf16.msra.mxu1 %v1175_v12  ;;  %v1202_v30 = vld [vmem:[#allocation3 + $0xec] ss:$16 sps:$4 sm:$0xff]   ;;  %v1204_v31 = vld [vmem:[#allocation3 + $0xe0] ss:$16 sps:$4 sm:$0xff]   ;;  %v1205_v32 = vld [vmem:[#allocation3 + $0xe8] ss:$16 sps:$4 sm:$0xff]  }
  0x21   :  { %460 = vmatprep.subr.bf16.mxu0 %v1176_v13  ;;  %501 = vmatprep.subr.bf16.mxu1 %v1178_v14  ;;  %v1206_v33 = vld [vmem:[#allocation3 + $0x104] ss:$16 sps:$4 sm:$0xff]   ;;  %v1208_v34 = vld [vmem:[#allocation3 + $0x10c] ss:$16 sps:$4 sm:$0xff]   ;;  %v1210_v35 = vld [vmem:[#allocation3 + $0x100] ss:$16 sps:$4 sm:$0xff]  }
  0x22   :  { %v1211_v36 = vld [vmem:[#allocation3 + $0x108] ss:$16 sps:$4 sm:$0xff]   ;;  %v1212_v37 = vld [vmem:[#allocation3 + $0x124] ss:$16 sps:$4 sm:$0xff]   ;;  %v1214_v38 = vld [vmem:[#allocation3 + $0x12c] ss:$16 sps:$4 sm:$0xff]  }
  0x23   :  { %v1216_v39 = vld [vmem:[#allocation3 + $0x120] ss:$16 sps:$4 sm:$0xff]   ;;  %v1217_v40 = vld [vmem:[#allocation3 + $0x128] ss:$16 sps:$4 sm:$0xff]   ;;  %v1218_v41 = vld [vmem:[#allocation3 + $0x144] ss:$16 sps:$4 sm:$0xff]  }
  0x24   :  { %461 = vmatpush1.bf16.msra.mxu0 %v1180_v15  ;;  %502 = vmatpush1.bf16.msra.mxu1 %v1181_v16  ;;  %v1220_v42 = vld [vmem:[#allocation3 + $0x14c] ss:$16 sps:$4 sm:$0xff]   ;;  %v1222_v43 = vld [vmem:[#allocation3 + $0x140] ss:$16 sps:$4 sm:$0xff]   ;;  %v1223_v44 = vld [vmem:[#allocation3 + $0x148] ss:$16 sps:$4 sm:$0xff]  }
  0x25   :  { %462 = vmatprep.subr.bf16.mxu0 %v1182_v17  ;;  %503 = vmatprep.subr.bf16.mxu1 %v1184_v18  ;;  %v1224_v45 = vld [vmem:[#allocation3 + $0x164] ss:$16 sps:$4 sm:$0xff]   ;;  %v1226_v46 = vld [vmem:[#allocation3 + $0x16c] ss:$16 sps:$4 sm:$0xff]   ;;  %v1228_v47 = vld [vmem:[#allocation3 + $0x160] ss:$16 sps:$4 sm:$0xff]  }
  0x26   :  { %v45_v48 = vld [vmem:[%s1523_s0 + $0x8] sm:$0xff]  ;;  %v1234_v53 = vld [vmem:[#allocation3 + $0x180] ss:$16 sps:$4 sm:$0xff]   ;;  %v1266_v17 = vld [vmem:[%s1526_s3 + $0x58] sm:$0xff]   ;;  %vm1342_vm0 = vmmov 0   ;;  %vm899_vm1 = vcmask 261120  }
  0x27   :  { %v1229_v49 = vld [vmem:[#allocation3 + $0x168] ss:$16 sps:$4 sm:$0xff]   ;;  %v47_v50 = vpack.c.bf16 %v45_v48, %v45_v48  ;;  %v1230_v51 = vld [vmem:[#allocation3 + $0x184] ss:$16 sps:$4 sm:$0xff]   ;;  %v1232_v52 = vld [vmem:[#allocation3 + $0x18c] ss:$16 sps:$4 sm:$0xff]  }
  0x28   :  { %463 = vmatpush1.bf16.msra.mxu0 %v1186_v19  ;;  %504 = vmatpush1.bf16.msra.mxu1 %v1187_v20  ;;  %v1235_v54 = vld [vmem:[#allocation3 + $0x188] ss:$16 sps:$4 sm:$0xff]   ;;  %v1236_v55 = vld [vmem:[#allocation3 + $0x1a4] ss:$16 sps:$4 sm:$0xff]   ;;  %v1238_v56 = vld [vmem:[#allocation3 + $0x1ac] ss:$16 sps:$4 sm:$0xff]  }
  0x29   :  { %464 = vmatprep.subr.bf16.mxu0 %v1188_v21  ;;  %505 = vmatprep.subr.bf16.mxu1 %v1190_v22  ;;  %v1240_v57 = vld [vmem:[#allocation3 + $0x1a0] ss:$16 sps:$4 sm:$0xff]   ;;  %v1241_v58 = vld [vmem:[#allocation3 + $0x1a8] ss:$16 sps:$4 sm:$0xff]   ;;  %v1242_v59 = vld [vmem:[#allocation3 + $0x1c4] ss:$16 sps:$4 sm:$0xff]  }
  0x2a   :  { %486 = vmatprep.mubr.bf16.mxu0 %v47_v50  ;;  %527 = vmatprep.mubr.bf16.mxu1 %v47_v50  ;;  %v1244_v60 = vld [vmem:[#allocation3 + $0x1cc] ss:$16 sps:$4 sm:$0xff]   ;;  %v1246_v61 = vld [vmem:[#allocation3 + $0x1c0] ss:$16 sps:$4 sm:$0xff]   ;;  %v1247_v62 = vld [vmem:[#allocation3 + $0x1c8] ss:$16 sps:$4 sm:$0xff]  }
  0x2b   :  { %v1248_v63 = vld [vmem:[#allocation3 + $0x1e4] ss:$16 sps:$4 sm:$0xff]   ;;  %v1250_v0 = vld [vmem:[#allocation3 + $0x1ec] ss:$16 sps:$4 sm:$0xff]   ;;  %v1252_v1 = vld [vmem:[#allocation3 + $0x1e0] ss:$16 sps:$4 sm:$0xff]  }
  0x2c   :  { %465 = vmatpush1.bf16.msra.mxu0 %v1192_v23  ;;  %506 = vmatpush1.bf16.msra.mxu1 %v1193_v24  ;;  %v1253_v2 = vld [vmem:[#allocation3 + $0x1e8] ss:$16 sps:$4 sm:$0xff]   ;;  %v44_v3 = vld [vmem:[%s1523_s0] sm:$0xff]  ;;  %v1262_v13 = vld [vmem:[%s1526_s3 + $0x50] sm:$0xff]   ;;  %vm982_vm2 = vcmask 57344  }
  0x2d   :  { %466 = vmatprep.subr.bf16.mxu0 %v1194_v25  ;;  %507 = vmatprep.subr.bf16.mxu1 %v1196_v26  ;;  %v1254_v4 = vld [vmem:[%s1526_s3 + $0x40] sm:$0xff]   ;;  %v46_v7 = vpack.c.bf16 %v44_v3, %v44_v3  ;;  %v1258_v9 = vld [vmem:[%s1526_s3 + $0x48] sm:$0xff]   ;;  %v1263_v14 = vld [vmem:[%s1526_s3 + $0xd0] sm:$0xff]  }
  0x2e   :  { %v1255_v5 = vld [vmem:[%s1526_s3 + $0xc0] sm:$0xff]   ;;  %v1259_v10 = vld [vmem:[%s1526_s3 + $0xc8] sm:$0xff]   ;;  %v1264_v15 = vld [vmem:[%s1526_s3 + $0x10] sm:$0xff]  }
  0x2f   :  { %v1256_v6 = vld [vmem:[%s1526_s3] sm:$0xff]   ;;  %v1260_v11 = vld [vmem:[%s1526_s3 + $0x8] sm:$0xff]   ;;  %v1265_v16 = vld [vmem:[%s1526_s3 + $0x90] sm:$0xff]  }
  0x30   :  { %467 = vmatpush1.bf16.msra.mxu0 %v1198_v27  ;;  %508 = vmatpush1.bf16.msra.mxu1 %v1199_v28  ;;  %v1257_v8 = vld [vmem:[%s1526_s3 + $0x80] sm:$0xff]   ;;  %v1261_v12 = vld [vmem:[%s1526_s3 + $0x88] sm:$0xff]   ;;  %v1267_v18 = vld [vmem:[%s1526_s3 + $0xd8] sm:$0xff]  }
  0x31   :  { %468 = vmatprep.subr.bf16.mxu0 %v1200_v29  ;;  %509 = vmatprep.subr.bf16.mxu1 %v1202_v30  ;;  %v1268_v19 = vld [vmem:[%s1526_s3 + $0x18] sm:$0xff]   ;;  %v1270_v21 = vld [vmem:[%s1526_s3 + $0x60] sm:$0xff]   ;;  %v1274_v25 = vld [vmem:[%s1526_s3 + $0x68] sm:$0xff]  }
  0x32   :  { %v1269_v20 = vld [vmem:[%s1526_s3 + $0x98] sm:$0xff]   ;;  %v1271_v22 = vld [vmem:[%s1526_s3 + $0xe0] sm:$0xff]   ;;  %v1275_v26 = vld [vmem:[%s1526_s3 + $0xe8] sm:$0xff]  }
  0x33   :  { %v1272_v23 = vld [vmem:[%s1526_s3 + $0x20] sm:$0xff]   ;;  %v1276_v27 = vld [vmem:[%s1526_s3 + $0x28] sm:$0xff]   ;;  %v1278_v29 = vld [vmem:[%s1526_s3 + $0x70] sm:$0xff]  }
  0x34   :  { %469 = vmatpush1.bf16.msra.mxu0 %v1204_v31  ;;  %510 = vmatpush1.bf16.msra.mxu1 %v1205_v32  ;;  %v1273_v24 = vld [vmem:[%s1526_s3 + $0xa0] sm:$0xff]   ;;  %v1277_v28 = vld [vmem:[%s1526_s3 + $0xa8] sm:$0xff]   ;;  %v1279_v30 = vld [vmem:[%s1526_s3 + $0xf0] sm:$0xff]  }
  0x35   :  { %470 = vmatprep.subr.bf16.mxu0 %v1206_v33  ;;  %511 = vmatprep.subr.bf16.mxu1 %v1208_v34  ;;  %v1280_v31 = vld [vmem:[%s1526_s3 + $0x30] sm:$0xff]   ;;  %v1282_v33 = vld [vmem:[%s1526_s3 + $0x78] sm:$0xff]  }
  0x36   :  { %v1281_v32 = vld [vmem:[%s1526_s3 + $0xb0] sm:$0xff]   ;;  %v1283_v34 = vld [vmem:[%s1526_s3 + $0xf8] sm:$0xff]  }
  0x38   :  { %471 = vmatpush1.bf16.msra.mxu0 %v1210_v35  ;;  %512 = vmatpush1.bf16.msra.mxu1 %v1211_v36  ;;  %v1284_v35 = vld [vmem:[%s1526_s3 + $0x38] sm:$0xff]  }
  0x39   :  { %472 = vmatprep.subr.bf16.mxu0 %v1212_v37  ;;  %513 = vmatprep.subr.bf16.mxu1 %v1214_v38  ;;  %v1285_v36 = vld [vmem:[%s1526_s3 + $0xb8] sm:$0xff]   ;;  %v114_v37 = vlaneseq }
  0x3b   :  { %v115_v38 = vshrl.u32 %v114_v37, 7 }
  0x3c   :  { %473 = vmatpush1.bf16.msra.mxu0 %v1216_v39  ;;  %514 = vmatpush1.bf16.msra.mxu1 %v1217_v40 }
  0x3d   :  { %474 = vmatprep.subr.bf16.mxu0 %v1218_v41  ;;  %515 = vmatprep.subr.bf16.mxu1 %v1220_v42  ;;  %v116_v39 = vsub.s32 0, %v115_v38  ;;  %v124_v40 = vsub.s32 2, %v115_v38  ;;  %v112_v41 = vld [vmem:[%s1525_s2] sm:$0xf]  ;;  %v120_v42 = vsub.s32 1, %v115_v38 }
  0x40   :  { %475 = vmatpush1.bf16.msra.mxu0 %v1222_v43  ;;  %516 = vmatpush1.bf16.msra.mxu1 %v1223_v44  ;;  %v128_v43 = vsub.s32 3, %v115_v38  ;;  %v117_v44 = vrot.slane %v112_v41, %v116_v39 }
  0x41   :  { %476 = vmatprep.subr.bf16.mxu0 %v1224_v45  ;;  %517 = vmatprep.subr.bf16.mxu1 %v1226_v46  ;;  %v125_v45 = vrot.slane %v112_v41, %v124_v40  ;;  %v121_v46 = vrot.slane %v112_v41, %v120_v42 }
  0x44   :  { %477 = vmatpush1.bf16.msra.mxu0 %v1228_v47  ;;  %518 = vmatpush1.bf16.msra.mxu1 %v1229_v49  ;;  %v129_v47 = vrot.slane %v112_v41, %v128_v43 }
  0x45   :  { %478 = vmatprep.subr.bf16.mxu0 %v1230_v51  ;;  %519 = vmatprep.subr.bf16.mxu1 %v1232_v52 }
  0x48   :  { %479 = vmatpush1.bf16.msra.mxu0 %v1234_v53  ;;  %520 = vmatpush1.bf16.msra.mxu1 %v1235_v54 }
  0x49   :  { %480 = vmatprep.subr.bf16.mxu0 %v1236_v55  ;;  %521 = vmatprep.subr.bf16.mxu1 %v1238_v56 }
  0x4c   :  { %481 = vmatpush1.bf16.msra.mxu0 %v1240_v57  ;;  %522 = vmatpush1.bf16.msra.mxu1 %v1241_v58 }
  0x4d   :  { %482 = vmatprep.subr.bf16.mxu0 %v1242_v59  ;;  %523 = vmatprep.subr.bf16.mxu1 %v1244_v60 }
  0x50   :  { %483 = vmatpush1.bf16.msra.mxu0 %v1246_v61  ;;  %524 = vmatpush1.bf16.msra.mxu1 %v1247_v62 }
  0x51   :  { %484 = vmatprep.subr.bf16.mxu0 %v1248_v63  ;;  %525 = vmatprep.subr.bf16.mxu1 %v1250_v0 }
  0x54   :  { %485 = vmatpush1.bf16.msra.mxu0 %v1252_v1  ;;  %526 = vmatpush1.bf16.msra.mxu1 %v1253_v2 }
  0x55   :  { %1099 = vmatprep.subr.bf16.mxu0 %v1254_v4  ;;  %1121 = vmatprep.subr.bf16.mxu1 %v1255_v5  ;;  %v1341_v4 = vmov 0.0   ;;  %v889_v5 = vld [vmem:[#allocation2] sm:$0x1] }
  0x57   :  { %487 = vmatmul.mubr.bf16.vlgmr.msra.gmra.mrb[0].mxu0 %v46_v7  ;;  %528 = vmatmul.mubr.bf16.vlgmr.msra.gmra.mrb[0].mxu1 %v46_v7 }
  0x58   :  { %1100 = vmatpush3.bf16.msra.mxu0 %v1256_v6  ;;  %1122 = vmatpush3.bf16.msra.mxu1 %v1257_v8  ;;  %v1343_v6 = vmov 0  }
  0x59   :  { %1101 = vmatprep.subr.bf16.mxu0 %v1258_v9  ;;  %1123 = vmatprep.subr.bf16.mxu1 %v1259_v10  ;;  %v1063_v9 = vld [vmem:[%s1527_s4] ss:$0 sm:$0xff]  ;;  %s1344_s4 = smov [#allocation6]  }
  0x5a   :  { %1157 = vset.pattern.permute.xlu0 %v1343_v6  ;;  %s990_s11 = sshll.u32 %s1344_s4, 4  ;;  %s991_s11 = int_to_ptr.vmem [resolvable:$true] %s990_s11 }
  0x5b   :  { %892 = vperm.xlu0 %1157, %v889_v5   ;;  %s1312_s6 = scalar_lea.vmem %s991_s11, 16  ;;  %p1317_p9 = scmp.lt.s32.totalorder %s991_s11, %s991_s11 }
  0x5c   :  { %1102 = vmatpush3.bf16.msra.mxu0 %v1260_v11  ;;  %1124 = vmatpush3.bf16.msra.mxu1 %v1261_v12  ;;  %p1313_p8 = scmp.ne.s32.totalorder %s991_s11, %s1312_s6 }
  0x5d   :  { %1103 = vmatprep.subr.bf16.mxu0 %v1262_v13  ;;  %1125 = vmatprep.subr.bf16.mxu1 %v1263_v14 }
  0x60   :  { %1104 = vmatpush3.bf16.msra.mxu0 %v1264_v15  ;;  %1126 = vmatpush3.bf16.msra.mxu1 %v1265_v16 }
  0x61   :  { %1105 = vmatprep.subr.bf16.mxu0 %v1266_v17  ;;  %1127 = vmatprep.subr.bf16.mxu1 %v1267_v18 }
  0x64   :  { %1106 = vmatpush3.bf16.msra.mxu0 %v1268_v19  ;;  %1128 = vmatpush3.bf16.msra.mxu1 %v1269_v20 }
  0x65   :  { %1107 = vmatprep.subr.bf16.mxu0 %v1270_v21  ;;  %1129 = vmatprep.subr.bf16.mxu1 %v1271_v22  ;;  %v888_v21 = vld [vmem:[%s1528_s5] sm:$0x1]  ;;  %s1316_s5 = scalar_lea.vmem %s991_s11, 32 }
  0x66   :  { %p1318_p10 = scmp.lt.s32.totalorder %s1316_s5, %s1312_s6 }
  0x68   :  { %1108 = vmatpush3.bf16.msra.mxu0 %v1272_v23  ;;  %1130 = vmatpush3.bf16.msra.mxu1 %v1273_v24  ;;  %p1319_p11 = por %p1318_p10, %p1317_p9 }
  0x69   :  { %1109 = vmatprep.subr.bf16.mxu0 %v1274_v25  ;;  %1131 = vmatprep.subr.bf16.mxu1 %v1275_v26 }
  0x6a   :  { %p1320_p12 = pnand %p1319_p11, %p1313_p8 }
  0x6c   :  { %1110 = vmatpush3.bf16.msra.mxu0 %v1276_v27  ;;  %1132 = vmatpush3.bf16.msra.mxu1 %v1277_v28 }
  0x6d   :  { %1111 = vmatprep.subr.bf16.mxu0 %v1278_v29  ;;  %1133 = vmatprep.subr.bf16.mxu1 %v1279_v30 }
  0x70   :  { %1112 = vmatpush3.bf16.msra.mxu0 %v1280_v31  ;;  %1134 = vmatpush3.bf16.msra.mxu1 %v1281_v32 }
  0x71   :  { %1113 = vmatprep.subr.bf16.mxu0 %v1282_v33  ;;  %1135 = vmatprep.subr.bf16.mxu1 %v1283_v34 }
  0x74   :  { %1114 = vmatpush3.bf16.msra.mxu0 %v1284_v35  ;;  %1136 = vmatpush3.bf16.msra.mxu1 %v1285_v36 }
  0x75   :  { %1145 = vmatprep.subr.mxu0 %v1341_v4 }
  0xda   :  { %v893_v22 = vpop.permute.xlu0 %892 }
  0xdb   :  { %v898_v23 = vrot.slane %v893_v22, %v116_v39 }
 0x12a   :  { %v488_v48 = vpop.f32.mrb[0].mxu0  ;;  %v529_v49 = vpop.f32.mrb[0].mxu1 }
 0x12b   :  { %v489_v50 = vadd.f32 %v488_v48, %v117_v44  ;;  %v530_v51 = vadd.f32 %v529_v49, %v125_v45  ;;  %v490_v52 = vpop.f32.mrb[1].mxu0  ;;  %v531_v53 = vpop.f32.mrb[1].mxu1 }
 0x12c   :  { %v491_v54 = vadd.f32 %v490_v52, %v121_v46  ;;  %v532_v55 = vadd.f32 %v531_v53, %v129_v47  ;;  %v492_v56 = vpop.f32.mrb[2].mxu0  ;;  %v533_v57 = vpop.f32.mrb[2].mxu1 }
 0x12d   :  { %v536_v58 = vmax.f32 %v489_v50, 0.0  ;;  %v538_v59 = vmax.f32 %v530_v51, 0.0  ;;  %v493_v60 = vpop.f32.mrb[3].mxu0  ;;  %v534_v61 = vpop.f32.mrb[3].mxu1 }
 0x12e   :  { %v537_v62 = vmax.f32 %v491_v54, 0.0  ;;  %v539_v63 = vmax.f32 %v532_v55, 0.0 }
 0x12f   :  { %v542_v0 = vpack.c.bf16 %v538_v59, %v538_v59  ;;  %v540_v3 = vpack.c.bf16 %v536_v58, %v536_v58 }
 0x130   :  { %v541_v1 = vpack.c.bf16 %v537_v62, %v537_v62  ;;  %v543_v2 = vpack.c.bf16 %v539_v63, %v539_v63 }
 0x132   :  { %839 = vmatprep.mubr.bf16.mxu0 %v541_v1  ;;  %879 = vmatprep.mubr.bf16.mxu1 %v543_v2 }
 0x133   :  { %840 = vmatmul.mubr.bf16.vlgmr.msra.gmra.mrb[4].mxu0 %v540_v3  ;;  %880 = vmatmul.mubr.bf16.vlgmr.msra.gmra.mrb[4].mxu1 %v542_v0 }
 0x134   :  { %1147 = vmatprep.mubr.msk.f32.mxu0 %vm1342_vm0, %v1341_v4 }
 0x206   :  { %v1115_v7 = vpop.f32.mrb[4].mxu0  ;;  %v1137_v8 = vpop.f32.mrb[4].mxu1 }
 0x207   :  { %v1116_v10 = vpop.f32.mrb[5].mxu0  ;;  %v1138_v11 = vpop.f32.mrb[5].mxu1 }
 0x208   :  { %v1117_v12 = vadd.f32 %v1116_v10, %v1115_v7  ;;  %v1139_v13 = vadd.f32 %v1138_v11, %v1137_v8  ;;  %v1118_v14 = vpop.f32.mrb[6].mxu0  ;;  %v1140_v15 = vpop.f32.mrb[6].mxu1 }
 0x209   :  { %v1119_v16 = vpop.f32.mrb[7].mxu0  ;;  %v1141_v17 = vpop.f32.mrb[7].mxu1 }
 0x20a   :  { %v842_v18 = vadd.f32 %v1117_v12, %v1063_v9 }
 0x20c   :  { %v882_v19 = vadd.f32 %v1139_v13, %v842_v18 }
 0x20e   :  { %v887_v20 = vmax.f32 %v882_v19, 0.0 }
 0x210   :  { %1146 = vmatpush3.xpose.msk.msra.mxu0 %vm899_vm1, %v887_v20 }
 0x213   :  { %1148 = vmatmul.mubr.msk.f32.vlgmr.msra.gmra.mrb[8].mxu0 %vm899_vm1, %v888_v21 }
 0x2e6   :  { %v972_v24 = vpop.f32.mrb[8].mxu0 }
 0x2e7   :  { %v973_v25 = vadd.f32 %v972_v24, %v898_v23  ;;  %v1149_v26 = vpop.f32.mrb[9].mxu0 }
 0x2e9   :  { %v1098_v27 = vmul.f32 -1.442695, %v973_v25 }
 0x2eb   :  { %1286 = vpow2.f32 %v1098_v27 }
 0x2f5   :  { %v1287_v28 = vpop.eup %1286 }
 0x2f6   :  { %v979_v29 = vadd.f32 1.0, %v1287_v28 }
 0x2f8   :  { %1288 = vrcp.f32 %v979_v29 }
 0x302   :  { %v1289_v30 = vpop.eup %1288 }
 0x303   :  { %983 = vst.msk [vmem:[#allocation6] sm:$0x1] %vm982_vm2, %v1289_v30 }
 0x304   :  { %1323 = shalt.err (!%p1320_p12)
}
 0x305   :  { %s1324_s14 = scalar_lea.hbm %s1530_s7, 16 }
 0x306   :  { %p1325_p13 = scmp.ne.s32.totalorder %s1530_s7, %s1324_s14  ;;  %p1328_p0 = scmp.lt.u32.totalorder %s1324_s14, %s1530_s7 }
 0x308   :  { %p1330_p1 = pnand %p1328_p0, %p1325_p13 }
 0x30a   :  { %1333 = shalt.err (!%p1330_p1)
}
 0x30b   :  { %993 = dma.vmem_to_hbm [thread:$0]  %s991_s11, 16, %s1530_s7, [#allocation5]  }
 0x30c   :  { %1336 = dma.done.wait [#allocation5], 16  }
 0x30d   :  { %1337 = vsyncadd [#allocation5], 4294967280 }
 0x30e   :  { %997 = vsyncpa [#allocation4], 1 }
 0x30f   :  { %998 = vsyncpa [#allocation5], 1 }

</bundles_post_ra>
